<compile_context>
chip_gen: v7x
topology: tpu7x:2x2x1
jax: 0.10.0
libtpu: 0.0.40
codegen_flags: <defaults>
</compile_context>

<pallas_src>
import functools

import jax
import jax.numpy as jnp
from jax import lax
from jax.experimental import pallas as pl
from jax.experimental.pallas import tpu as pltpu


def _cdiv(a, b):
    return -(-a // b)


def _hw_budgets():
    """(per-step HBM byte target, single-image VMEM cap, vmem_limit cap)."""
    kind = ""
    try:
        kind = jax.devices()[0].device_kind.lower()
    except Exception:
        pass
    if "v7" in kind or "7x" in kind:
        # v7x: 64 MiB physical VMEM, highest HBM BW -> smaller steps, tight VMEM.
        return 8 << 20, 36 << 20, 56 << 20
    if "v5" in kind or "v6" in kind or "trillium" in kind:
        # v5e/v6e: 128 MiB VMEM, lower HBM BW -> biggest slabs.
        return 16 << 20, 56 << 20, 100 << 20
    return 16 << 20, 44 << 20, 64 << 20


def _pick_blocking(nc, per_img_bytes, step_target, kb_cap):
    """Images per grid step (kb) and grid length for the NC-blocked path."""
    # Enough steps that each step moves <= step_target bytes, but also at
    # least ~8 steps (when NC allows) so both v7x TensorCores stay busy and
    # the pipeline has depth.
    steps = max(_cdiv(nc * per_img_bytes, step_target), min(nc, 8))
    steps = min(steps, nc)
    kb = max(1, min(_cdiv(nc, steps), kb_cap))
    grid = _cdiv(nc, kb)
    # Prefer an even number of steps (two v7x TensorCores share the "parallel"
    # axis); only shrink kb a little (never below half) to get it.
    if grid % 2 and grid > 1:
        for kb2 in range(kb - 1, max(kb // 2, 1) - 1, -1):
            if _cdiv(nc, kb2) % 2 == 0:
                kb = kb2
                break
        grid = _cdiv(nc, kb)
    return kb, grid


def _pad_kernel(x_ref, o_ref, *, pad_top, pad_bot, pad_left, pad_right, fill):
    """x_ref: (kb, H, W); o_ref: (kb, Ho, Wo).  Every output byte written once."""
    kb, h, _ = x_ref.shape
    _, _, wo = o_ref.shape
    dt = o_ref.dtype
    # NOTE: fractional fills truncate for integer dtypes (matches torch cast).
    fillv = jnp.asarray(fill, dtype=dt)

    x = x_ref[...]

    # W padding built at the value level (lane-axis concatenate -> one
    # full-width row store; the shifts/selects ride the VPU/XLU for free).
    if pad_left or pad_right:
        parts = []
        if pad_left:
            parts.append(jnp.full((kb, h, pad_left), fillv, dtype=dt))
        parts.append(x)
        if pad_right:
            parts.append(jnp.full((kb, h, pad_right), fillv, dtype=dt))
        x = jnp.concatenate(parts, axis=-1)

    # H padding as full-lane-width row-strip stores.
    if pad_top:
        o_ref[:, :pad_top, :] = jnp.full((kb, pad_top, wo), fillv, dtype=dt)
    if pad_bot:
        o_ref[:, pad_top + h:, :] = jnp.full((kb, pad_bot, wo), fillv, dtype=dt)
    o_ref[:, pad_top:pad_top + h, :] = x


def _pad_strip_kernel(xa_ref, xb_ref, o_ref, buf_ref, *, pad_top, pad_left,
                      pad_right, fill, rh, h_in, nib):
    """H-strip kernel for images too large for a single VMEM block.

    xa_ref / xb_ref: (1, rh, W) -- the two adjacent input row blocks this
    output strip can touch.  buf_ref: (1, 3*rh, W) scratch laid out as
    [fill prefix | block A | block B] so a static-size, dynamic-start sublane
    slice realigns the pad_top offset.  o_ref: (1, rh, Wo).
    """
    j = pl.program_id(1)
    kb, _, w = xa_ref.shape
    dt = o_ref.dtype
    fillv = jnp.asarray(fill, dtype=dt)

    if pad_top:
        # Only strips overlapping the top pad ever read the fill prefix.
        @pl.when(j * rh < pad_top)
        def _():
            buf_ref[:, :rh, :] = jnp.full((kb, rh, w), fillv, dtype=dt)

    buf_ref[:, rh:2 * rh, :] = xa_ref[...]
    buf_ref[:, 2 * rh:, :] = xb_ref[...]

    # Same block choice as the index_maps; start of this strip's source rows
    # inside buf (buf row rh + m == input row ja*rh + m).
    ja = jnp.clip((j * rh - pad_top) // rh, 0, nib - 1)
    start = jnp.clip(rh + j * rh - pad_top - ja * rh, 0, 2 * rh)
    slab = buf_ref[:, pl.ds(start, rh), :]

    # Rows past the valid input range (bottom pad / garbage rows of a partial
    # last input block) become fill; the prefix already covers the top pad.
    r_in = (j * rh - pad_top
            + lax.broadcasted_iota(jnp.int32, (kb, rh, 1), 1))
    slab = jnp.where((r_in >= 0) & (r_in < h_in), slab, fillv)

    if pad_left or pad_right:
        parts = []
        if pad_left:
            parts.append(jnp.full((kb, rh, pad_left), fillv, dtype=dt))
        parts.append(slab)
        if pad_right:
            parts.append(jnp.full((kb, rh, pad_right), fillv, dtype=dt))
        slab = jnp.concatenate(parts, axis=-1)

    o_ref[...] = slab


def pad_v14(x, padding, fill=0.0, padding_mode="constant", *,
            _force_strip_rows=None):
    """Pallas equivalent of PadV14.forward(x) == F.pad(x, padding, mode, fill)."""
    if padding_mode != "constant":
        # TODO(synk): 'reflect'/'replicate'/'circular' modes not implemented.
        raise NotImplementedError("only constant padding is supported")
    if x.ndim != 4:
        raise ValueError("pad_v14 expects a 4-D NCHW input")

    if len(padding) == 2:
        p_left, p_right = padding
        p_top = p_bot = 0
    elif len(padding) == 4:
        p_left, p_right, p_top, p_bot = padding
    else:
        raise ValueError("padding must have length 2 or 4 for a 4-D NCHW input")

    N, C, H, W = x.shape
    dtype = x.dtype
    itemsize = jnp.dtype(dtype).itemsize

    # Negative pads crop the input (torch semantics); validate and crop with a
    # cheap slice so the kernel only ever sees non-negative padding.
    crop_t, crop_b = max(0, -p_top), max(0, -p_bot)
    crop_l, crop_r = max(0, -p_left), max(0, -p_right)
    if crop_t + crop_b > H or crop_l + crop_r > W:
        raise ValueError("negative padding exceeds the corresponding dimension")
    if crop_t or crop_b or crop_l or crop_r:
        x = x[:, :, crop_t:H - crop_b, crop_l:W - crop_r]
        H -= crop_t + crop_b
        W -= crop_l + crop_r
    p_top, p_bot = max(0, p_top), max(0, p_bot)
    p_left, p_right = max(0, p_left), max(0, p_right)

    Ho, Wo = H + p_top + p_bot, W + p_left + p_right
    NC = N * C

    # Degenerate cases: nothing to copy (or nothing at all) -> no kernel.
    if NC == 0 or Ho == 0 or Wo == 0 or H == 0 or W == 0:
        return jnp.full((N, C, Ho, Wo), fill, dtype=dtype)

    step_target, img_vmem_cap, vmem_cap = _hw_budgets()
    in_img = H * W * itemsize
    out_img = Ho * Wo * itemsize
    fits_in_vmem = 3 * (in_img + out_img) + (2 << 20) <= img_vmem_cap
    use_strip = (_force_strip_rows is not None) or not fits_in_vmem

    # ---------- Path A: whole (cropped) images fit comfortably in VMEM. ----------
    if not use_strip:
        if p_left == 0 and p_right == 0:
            # Lane-dense fast path: flatten each image to one row so the H pad
            # becomes lane padding and every store is a full-width row store.
            hk, wk = 1, H * W
            pt_k = pb_k = 0
            pl_k, pr_k = p_top * W, p_bot * W
            ho_k, wo_k = 1, Ho * W
            xf = x.reshape(NC, 1, H * W)
        else:
            hk, wk, ho_k, wo_k = H, W, Ho, Wo
            pt_k, pb_k, pl_k, pr_k = p_top, p_bot, p_left, p_right
            xf = x.reshape(NC, H, W)

        kb_cap = max(1, (vmem_cap - (8 << 20)) // (3 * (in_img + out_img)))
        kb, grid0 = _pick_blocking(NC, in_img + out_img, step_target, kb_cap)
        # 2x double-buffered in/out + the W-concatenate intermediate + headroom.
        vmem_need = kb * 3 * (in_img + out_img) + (4 << 20)
        vmem_limit = int(max(16 << 20, min(vmem_need, vmem_cap)))

        kernel = functools.partial(
            _pad_kernel, pad_top=pt_k, pad_bot=pb_k, pad_left=pl_k,
            pad_right=pr_k, fill=fill)
        out = pl.pallas_call(
            kernel,
            out_shape=jax.ShapeDtypeStruct((NC, ho_k, wo_k), dtype),
            grid=(grid0,),
            # Last two block dims equal the full (collapsed) array dims, so the
            # (8, 128) tiling constraint is satisfied; the partial last NC
            # block is masked by Pallas.
            in_specs=[pl.BlockSpec((kb, hk, wk), lambda i: (i, 0, 0))],
            out_specs=pl.BlockSpec((kb, ho_k, wo_k), lambda i: (i, 0, 0)),
            compiler_params=pltpu.CompilerParams(
                dimension_semantics=("parallel",),
                vmem_limit_bytes=vmem_limit),
        )(xf)
        return out.reshape(N, C, Ho, Wo)

    # ---------- Path B: single image too large -> tile H into row strips. ----------
    # NOTE: each strip reads the two adjacent input row blocks it may touch
    # (~1.5x total HBM traffic); this only runs for images that cannot fit in
    # VMEM as one block.
    per_row_vmem = itemsize * (10 * W + 4 * Wo)       # conservative VMEM / row
    if _force_strip_rows is not None:
        rh = int(_force_strip_rows)
    else:
        rh = (img_vmem_cap - (2 << 20)) // per_row_vmem
        rh = min(rh, max(step_target // (itemsize * (2 * W + Wo)), 32))
        if H >= 32:
            rh = min(rh, (H // 32) * 32)
    rh = (rh // 32) * 32                               # sublane tile for any dtype
    if rh < 32:
        # TODO(synk): rows wider than the VMEM budget would need W tiling too;
        # fall back to XLA's pad for this extreme aspect ratio.
        return jnp.pad(x, ((0, 0), (0, 0), (p_top, p_bot), (p_left, p_right)),
                       mode="constant", constant_values=jnp.asarray(fill, dtype))

    xf = x.reshape(NC, H, W)
    nib = _cdiv(H, rh)          # number of input row blocks
    grid_h = _cdiv(Ho, rh)      # number of output row strips
    vmem_limit = int(max(16 << 20, min(rh * per_row_vmem + (4 << 20), vmem_cap)))

    def a_map(i, j):
        return (i, jnp.clip((j * rh - p_top) // rh, 0, nib - 1), 0)

    def b_map(i, j):
        return (i, jnp.clip((j * rh - p_top) // rh + 1, 0, nib - 1), 0)

    kernel = functools.partial(
        _pad_strip_kernel, pad_top=p_top, pad_left=p_left, pad_right=p_right,
        fill=fill, rh=rh, h_in=H, nib=nib)
    out = pl.pallas_call(
        kernel,
        out_shape=jax.ShapeDtypeStruct((NC, Ho, Wo), dtype),
        grid=(NC, grid_h),
        in_specs=[pl.BlockSpec((1, rh, W), a_map),
                  pl.BlockSpec((1, rh, W), b_map)],
        out_specs=pl.BlockSpec((1, rh, Wo), lambda i, j: (i, j, 0)),
        scratch_shapes=[pltpu.VMEM((1, 3 * rh, W), dtype)],
        compiler_params=pltpu.CompilerParams(
            dimension_semantics=("parallel", "parallel"),
            vmem_limit_bytes=vmem_limit),
    )(xf, xf)
    return out.reshape(N, C, Ho, Wo)


if __name__ == "__main__":
    key = jax.random.PRNGKey(0)
    k0, k1 = jax.random.split(key)
    x = jax.random.normal(k0, (2, 4, 16, 16), dtype=jnp.float32)

    # 4-tuple constant padding with non-zero fill (general W+H path).
    out = jax.block_until_ready(pad_v14(x, (2, 2, 1, 1), fill=0.5))
    ref = jnp.pad(x, ((0, 0), (0, 0), (1, 1), (2, 2)), constant_values=0.5)
    assert out.shape == ref.shape and jnp.allclose(out, ref)

    # 2-tuple (W-only) padding.
    out2 = jax.block_until_ready(pad_v14(x, (3, 1)))
    ref2 = jnp.pad(x, ((0, 0), (0, 0), (0, 0), (3, 1)))
    assert jnp.allclose(out2, ref2)

    # H-only padding -> lane-dense flattened fast path.
    out3 = jax.block_until_ready(pad_v14(x, (0, 0, 2, 3), fill=-1.25))
    ref3 = jnp.pad(x, ((0, 0), (0, 0), (2, 3), (0, 0)), constant_values=-1.25)
    assert jnp.allclose(out3, ref3)

    # Negative padding (crop) mixed with positive, as torch allows.
    out4 = jax.block_until_ready(pad_v14(x, (-2, 2, 1, -3)))
    ref4 = jnp.pad(x[:, :, :13, 2:], ((0, 0), (0, 0), (1, 0), (0, 2)))
    assert out4.shape == ref4.shape and jnp.allclose(out4, ref4)

    # H-strip path (forced at small scale): W+H padding and H-only padding.
    xb = jax.random.normal(k1, (1, 2, 64, 128), dtype=jnp.float32)
    out5 = jax.block_until_ready(
        pad_v14(xb, (2, 3, 5, 9), fill=0.25, _force_strip_rows=32))
    ref5 = jnp.pad(xb, ((0, 0), (0, 0), (5, 9), (2, 3)), constant_values=0.25)
    assert out5.shape == ref5.shape and jnp.allclose(out5, ref5)

    out6 = jax.block_until_ready(pad_v14(xb, (0, 0, 7, 4), _force_strip_rows=32))
    ref6 = jnp.pad(xb, ((0, 0), (0, 0), (7, 4), (0, 0)))
    assert jnp.allclose(out6, ref6)

    print("KERNEL_OK")
</pallas_src>

<mosaic_0001>
module attributes {stable_mosaic.version = 11 : i64} {
  func.func @_pad_kernel(%arg0: i32, %arg1: memref<1x16x16xf32, #tpu.memory_space<vmem>>, %arg2: memref<1x18x20xf32, #tpu.memory_space<vmem>>) attributes {dimension_semantics = [#tpu.dimension_semantics<parallel>], iteration_bounds = array<i64: 8>, scalar_prefetch = 0 : i64, scratch_operands = 0 : i64, tpu.core_type = #tpu.core_type<tc>, window_params = [{transform_indices = @transform_0, window_bounds = array<i64: 1, 16, 16>}, {transform_indices = @transform_1, window_bounds = array<i64: 1, 18, 20>}]} {
    %c0 = arith.constant 0 : index
    %c0_0 = arith.constant 0 : index
    %c0_1 = arith.constant 0 : index
    %0 = vector.load %arg1[%c0, %c0_0, %c0_1] : memref<1x16x16xf32, #tpu.memory_space<vmem>>, vector<1x16x16xf32>
    %cst = arith.constant 5.000000e-01 : f32
    %1 = vector.broadcast %cst : f32 to vector<1x16x2xf32>
    %cst_2 = arith.constant 5.000000e-01 : f32
    %2 = vector.broadcast %cst_2 : f32 to vector<1x16x2xf32>
    %3 = tpu.concatenate %1, %0, %2 in 2 : vector<1x16x2xf32>, vector<1x16x16xf32>, vector<1x16x2xf32> -> vector<1x16x20xf32>
    %cst_3 = arith.constant 5.000000e-01 : f32
    %4 = vector.broadcast %cst_3 : f32 to vector<1x1x20xf32>
    %c0_4 = arith.constant 0 : index
    %c0_5 = arith.constant 0 : index
    %c0_6 = arith.constant 0 : index
    %5 = vector.load %arg2[%c0_4, %c0_5, %c0_6] : memref<1x18x20xf32, #tpu.memory_space<vmem>>, vector<1x1x20xf32>
    tpu.vector_store %arg2[%c0_4, %c0_5, %c0_6], %4 {strides = array<i32>} : memref<1x18x20xf32, #tpu.memory_space<vmem>>, vector<1x1x20xf32>,
    %cst_7 = arith.constant 5.000000e-01 : f32
    %6 = vector.broadcast %cst_7 : f32 to vector<1x1x20xf32>
    %c0_8 = arith.constant 0 : index
    %c17 = arith.constant 17 : index
    %c0_9 = arith.constant 0 : index
    %7 = vector.load %arg2[%c0_8, %c17, %c0_9] : memref<1x18x20xf32, #tpu.memory_space<vmem>>, vector<1x1x20xf32>
    tpu.vector_store %arg2[%c0_8, %c17, %c0_9], %6 {strides = array<i32>} : memref<1x18x20xf32, #tpu.memory_space<vmem>>, vector<1x1x20xf32>,
    %c0_10 = arith.constant 0 : index
    %c1 = arith.constant 1 : index
    %c0_11 = arith.constant 0 : index
    %8 = vector.load %arg2[%c0_10, %c1, %c0_11] : memref<1x18x20xf32, #tpu.memory_space<vmem>>, vector<1x16x20xf32>
    tpu.vector_store %arg2[%c0_10, %c1, %c0_11], %3 {strides = array<i32>} : memref<1x18x20xf32, #tpu.memory_space<vmem>>, vector<1x16x20xf32>,
    return
  }
  func.func @transform_0(%arg0: i32) -> (i32, i32, i32) {
    %c0_i32 = arith.constant 0 : i32
    %c0_i32_0 = arith.constant 0 : i32
    %c0_i32_1 = arith.constant 0 : i32
    return %arg0, %c0_i32, %c0_i32_0 : i32, i32, i32
  }
  func.func @transform_1(%arg0: i32) -> (i32, i32, i32) {
    %c0_i32 = arith.constant 0 : i32
    %c0_i32_0 = arith.constant 0 : i32
    %c0_i32_1 = arith.constant 0 : i32
    return %arg0, %c0_i32, %c0_i32_0 : i32, i32, i32
  }
}

</mosaic_0001>

<bundles_post_ra>
// kernel: tpu_custom_call.1
= control target key start
LH: loop header
LB: loop body
LE: loop exit
PB: predicated region body
PF: predicated region fallthrough
CT: control target
= control target key end

     0   :  { %6 = vsyncpa [#allocation3], 0  ;;  %s471_s0 = inlined_call_operand.hbm [shape: f32[8,16,16], index: 0, kind: input, shape index: {}]   ;;  %s472_s1 = inlined_call_operand.vmem [shape: f32[8,18,20], index: 1, kind: output, shape index: {}]  }
   0x1   :  { %8 = vsyncpa [#allocation3 + $0x1], 0  ;;  %s363_s6 = smov 0   ;;  %s365_s7 = smov 0  }
   0x2   :  { %s367_s8 = smov 0   ;;  %s369_s9 = smov 0  }
   0x3 LB: > { %s382_s10 = sadd.s32 4294967295, %s346_s9   ;;  %s385_s11 = sadd.s32 1, %s346_s9   ;;  %s346_s9 = sphi %s369_s9, %s479_s9   ;;  %s342_s8 = sphi %s367_s8, %s478_s8   ;;  %s338_s7 = sphi %s365_s7, %s477_s7   ;;  %s334_s6 = sphi %s363_s6, %s476_s6  }
   0x4   : > { %s18_s12 = ssub.s32 %s346_s9, %s385_s11  ;;  %s21_s13 = sadd.s32 1, %s342_s8 }
   0x5   : > { %p19_p0 = scmp.eq.s32.totalorder %s18_s12, 0  ;;  %p28_p1 = scmp.ne.s32.totalorder %s342_s8, %s338_s7 }
   0x6   : > { %p29_p2 = scmp.eq.s32.totalorder %s346_s9, 0  ;;  %p34_p3 = scmp.ne.s32.totalorder %s338_s7, %s334_s6 }
   0x7   : > { %s395_s14 = scalar_select %p19_p0, %s342_s8, %s21_s13  }
   0x8   : > { %p30_p4 = por %p29_p2, %p28_p1  ;;  %p35_p5 = scmp.eq.s32.totalorder %s382_s10, 0 }
   0x9   : > { %p245_p6 = scmp.lt.s32.totalorder %s346_s9, 8  ;;  %s84_s16 = sand.u32 1, %s342_s8  }
   0xa   : > { %p399_p7 = por %p35_p5, %p34_p3  ;;  %s229_s17 = sshll.u32 %s84_s16, 4 }
   0xb   : > { %s237_s18 = sshll.u32 %s346_s9, 8  ;;  %s88_s22 = scalar_lea.vmem [#allocation2], %s229_s17 }
   0xc   : > { %s408_s21 = scalar_lea.hbm %s471_s0, %s237_s18  ;;  %s95_s23 = sshll.u32 %s88_s22, 4  ;;  %s410_s23 = int_to_ptr.vmem [resolvable:$true] %s95_s23 }
   0xd   : > { %p412_p8 = pnand %p245_p6, %p30_p4  ;;  %s417_s25 = scalar_lea.sflag [#allocation3], %s84_s16 }
   0xe   : > { %s282_s26 = scalar_lea.hbm %s408_s21, 256  ;;  %s287_s29 = scalar_lea.hbm %s471_s0, 2048 }
   0xf   : > { %p283_p10 = scmp.ne.s32.totalorder %s408_s21, %s282_s26  ;;  %p284_p11 = pneg %p412_p8 }
  0x10   : > { %p288_p0 = scmp.lt.u32.totalorder %s408_s21, %s471_s0  ;;  %p289_p1 = scmp.lt.u32.totalorder %s287_s29, %s282_s26 }
  0x11   : > { %p285_p12 = pnand %p284_p11, %p283_p10  ;;  %p291_p3 = scmp.lt.u32.totalorder %s282_s26, %s408_s21 }
  0x12   : > { %p290_p2 = por %p289_p1, %p288_p0 }
  0x13   : > { %p286_p13 = pneg %p285_p12 }
  0x14   : > { %p292_p4 = por %p291_p3, %p290_p2 }
  0x16   : > { %p293_p5 = pnand %p292_p4, %p286_p13 }
  0x18   : > { %296 = shalt.err (!%p293_p5)
}
  0x19   : > { %s297_s3 = scalar_lea.vmem %s410_s23, 256  ;;  %s348_s4 = smov [#allocation2]  }
  0x1a   : > { %p298_p6 = scmp.ne.s32.totalorder %s410_s23, %s297_s3  ;;  %s302_s5 = sshll.u32 %s348_s4, 4  ;;  %s303_s5 = int_to_ptr.vmem [resolvable:$false] %s302_s5 }
  0x1b   : > { %s304_s6 = scalar_lea.vmem %s303_s5, 512  ;;  %p305_p9 = scmp.lt.s32.totalorder %s410_s23, %s303_s5 }
  0x1c   : > { %p300_p10 = pnand %p298_p6, %p284_p11  ;;  %p306_p0 = scmp.lt.s32.totalorder %s304_s6, %s297_s3 }
  0x1e   : > { %p301_p12 = pneg %p300_p10  ;;  %p307_p1 = por %p306_p0, %p305_p9 }
  0x20   : > { %p308_p2 = pnand %p307_p1, %p301_p12 }
  0x22   : > { %311 = shalt.err (!%p308_p2)
}
  0x23   : > { %s349_s12 = smov 128   ;;  %s350_s13 = smov 8  }
  0x24   : > { %244 = dma.hbm_to_vmem [thread:$0]  (!%p412_p8), %s408_s21, 256, %s410_s23, %s417_s25, %s349_s12, %s349_s12, %s350_s13  }
  0x25   : > { %p103_p11 = scmp.lt.s32.totalorder %s346_s9, 9  ;;  %p475_p13 = scmp.ge.s32.totalorder %s346_s9, 1 }
  0x27   : > { %p104_p3 = pnand %p475_p13, %p103_p11 }
  0x28   : > { %s109_s16 = sand.u32 (!%p104_p3), 1, %s338_s7  }
  0x29   : > { %107 = sbr.rel (%p104_p3) target bundleno = 172 (0xac), region = 24  ;;  %s233_s17 = sshll.u32 (!%p104_p3), %s109_s16, 4 }
  0x2a   : > { %s110_s18 = scalar_lea.sflag (!%p104_p3), [#allocation3], %s109_s16  ;;  %s113_s19 = scalar_lea.vmem (!%p104_p3), [#allocation2], %s233_s17 }
  0x30   : > { %329 = dma.done.wait (%p399_p7), %s110_s18, 256  }
  0x31   : > { %331 = vsyncadd (%p399_p7), %s110_s18, 4294967040  ;;  %p132_p9 = scmp.lt.s32.totalorder %s382_s10, 7  ;;  %vm153_vm0 = vcmask 155648   ;;  %v351_v0 = vmov 0.5   ;;  %v137_v1 = vld [vmem:[%s113_s19] sm:$0xff]  ;;  %s352_s23 = smov 2  }
  0x32   : > { %141 = vrot.lane.b32.xlu0 %v137_v1, %s352_s23  ;;  %v138_v2 = vld [vmem:[%s113_s19 + $0x8] sm:$0xff]  ;;  %vm147_vm1 = vcmask 15360   ;;  %vm150_vm2 = vcmask 146432   ;;  %vm156_vm3 = vcmask 162816  }
  0x33   : > { %s481_s10 = smov (!%p132_p9, %s382_s10), 7 }
  0x34   : > { %s238_s20 = smul.u32 24, %s481_s10 }
  0x36   : > { %s136_s22 = scalar_lea.vmem %s472_s1, %s238_s20  ;;  %143 = vrot.lane.b32.xlu0 %v138_v2, %s352_s23 }
  0x37   : > { %154 = vst.msk [vmem:[%s136_s22] sm:$0x1] %vm153_vm0, %v351_v0  ;;  %155 = vst.msk [vmem:[%s136_s22 + $0x11] sm:$0x1] %vm153_vm0, %v351_v0 }
  0xa4   : > { %v142_v3 = vpop.permute.xlu0 %141 }
  0xa5   : > { %v148_v4 = vsel %vm147_vm1, 0.5, %v142_v3 }
  0xa6   : > { %v151_v5 = vsel %vm150_vm2, %v148_v4, 0.5 }
  0xa7   : > { %157 = vst.msk [vmem:[%s136_s22 + $0x1] sm:$0xff] %vm156_vm3, %v151_v5 }
  0xa8   : > { %v144_v6 = vpop.permute.xlu0 %143 }
  0xa9   : > { %v149_v7 = vsel %vm147_vm1, 0.5, %v144_v6 }
  0xaa   : > { %v152_v8 = vsel %vm150_vm2, %v149_v7, 0.5 }
  0xab   : > { %158 = vst.msk [vmem:[%s136_s22 + $0x9] sm:$0xff] %vm156_vm3, %v152_v8 }
  0xac PF: > { %p11_p7 = scmp.ge.s32.totalorder %s385_s11, 10   ;;  %s476_s6 = smov %s338_s7 }
  0xad   : > { %s477_s7 = smov %s342_s8  ;;  %s478_s8 = smov %s395_s14 }
  0xae   : > { %s479_s9 = smov %s385_s11  ;;  %13 = sbr.rel (!%p11_p7) target bundleno = 3 (0x3), region = 64 }
  0xb5   :  { %180 = vsyncpa [#allocation3], 1 }
  0xb6   :  { %182 = vsyncpa [#allocation3 + $0x1], 1 }

</bundles_post_ra>
